<compile_context>
chip_gen: v7x
topology: tpu7x:2x2x1
jax: 0.10.0
libtpu: 0.0.40
codegen_flags: <defaults>
</compile_context>

<pallas_src>
import jax
import jax.numpy as jnp
from jax.experimental import pallas as pl
from jax.experimental.pallas import tpu as pltpu


_LANE = 128
_N_F32_TEMPS = 6            # conservative count of live full-tile f32 temporaries
_V7X_LIKE_VMEM = 80 * 1024 * 1024   # <= this physical VMEM -> assume 2-TC v7x-class part
_FALLBACK_VMEM = 64 * 1024 * 1024   # conservative fallback if get_tpu_info() unavailable


def _stce_kernel(x_ref, y_ref, loss_ref):
    # x_ref, y_ref: (tile_n, C) tiles in VMEM (C is the full, possibly
    # non-128-multiple class axis; Mosaic masks the internal lane padding for
    # the axis=-1 reductions below). loss_ref: (tile_n, 1) f32.
    x = x_ref[...].astype(jnp.float32)
    y = y_ref[...].astype(jnp.float32)

    # Row terms that do NOT depend on the shifted logits (shorter live ranges).
    sy = jnp.sum(y, axis=-1, keepdims=True)           # sum_c y
    sxy = jnp.sum(y * x, axis=-1, keepdims=True)      # sum_c y * x

    # Numerically stable log-sum-exp along the lane (class) axis.
    m = jnp.max(x, axis=-1, keepdims=True)
    lse = jnp.log(jnp.sum(jnp.exp(x - m), axis=-1, keepdims=True))

    # Fused soft-target CE:
    #   sum_c -y * (x - m - lse) = (m + lse) * sum(y) - sum(y * x)
    loss_ref[...] = (m + lse) * sy - sxy


def _tpu_vmem_capacity_bytes() -> int:
    try:
        return int(pltpu.get_tpu_info().vmem_capacity_bytes)
    except Exception:
        return _FALLBACK_VMEM


def _sublane_align(dtype) -> int:
    # f32 -> 8 sublanes, bf16 -> 16, int8/fp8 -> 32.
    return max(8, 32 // jnp.dtype(dtype).itemsize)


def _choose_tile_n(n, c, x_dtype, y_dtype, vmem_physical, min_grid_steps) -> int:
    xb = jnp.dtype(x_dtype).itemsize
    yb = jnp.dtype(y_dtype).itemsize
    align = max(_sublane_align(x_dtype), _sublane_align(y_dtype))

    # Working-set budget: ~37.5% of physical VMEM (24 MiB on v7x, 48 MiB on
    # 128 MiB v5e/v6e parts) -- leaves room for Mosaic internal scratch.
    budget = (vmem_physical * 3) // 8

    # Per-row VMEM cost: 2x double-buffered input rows + live f32 temporaries.
    bytes_per_row = 2 * c * (xb + yb) + _N_F32_TEMPS * c * 4
    tile_from_mem = max(align, budget // bytes_per_row)
    # Keep at least `min_grid_steps` grid steps when N allows (megacore /
    # pipelining), but no more: extra steps are pure ~0.35 us/step overhead.
    tile_from_steps = max(align, n // min_grid_steps)

    tile = min(tile_from_mem, tile_from_steps)
    tile = max(align, (tile // align) * align)
    # No point in a tile taller than N (rounded up to the sublane alignment).
    n_up = ((n + align - 1) // align) * align
    return min(tile, n_up)


def _vmem_limit_bytes(tile_n, c, x_dtype, y_dtype, vmem_physical) -> int:
    xb = jnp.dtype(x_dtype).itemsize
    yb = jnp.dtype(y_dtype).itemsize
    est = (2 * tile_n * c * (xb + yb)          # double-buffered input blocks
           + _N_F32_TEMPS * tile_n * c * 4     # live f32 temporaries
           + 2 * tile_n * 4)                   # double-buffered (tile_n, 1) output
    req = (est * 3) // 2                       # 1.5x headroom
    lo = 16 * 1024 * 1024                      # modest floor for Mosaic internals
    hi = (vmem_physical * 3) // 5              # never request > 60% of physical
    return int(min(hi, max(lo, req)))


def soft_target_cross_entropy(x, y, reduction="mean", tile_n=None):
    """x: (N, C) logits, y: (N, C) soft targets. Matches SoftTargetCrossEntropy.forward."""
    assert x.shape == y.shape and x.ndim == 2
    n, c = x.shape
    assert n > 0 and c > 0

    vmem_physical = _tpu_vmem_capacity_bytes()
    # v7x-class parts (2 TensorCores, 64 MiB/TC): keep >= 4 grid steps so both
    # cores get work. Single-TC parts: grid is a sequential loop, 2 is enough.
    min_grid_steps = 4 if vmem_physical <= _V7X_LIKE_VMEM else 2

    if tile_n is None:
        tile_n = _choose_tile_n(n, c, x.dtype, y.dtype, vmem_physical, min_grid_steps)
    else:
        align = max(_sublane_align(x.dtype), _sublane_align(y.dtype))
        tile_n = max(align, (int(tile_n) // align) * align)

    grid = (pl.cdiv(n, tile_n),)

    per_row = pl.pallas_call(
        _stce_kernel,
        out_shape=jax.ShapeDtypeStruct((n, 1), jnp.float32),
        grid_spec=pltpu.PrefetchScalarGridSpec(
            num_scalar_prefetch=0,
            grid=grid,
            in_specs=[
                pl.BlockSpec((tile_n, c), lambda i: (i, 0)),
                pl.BlockSpec((tile_n, c), lambda i: (i, 0)),
            ],
            out_specs=pl.BlockSpec((tile_n, 1), lambda i: (i, 0)),
        ),
        compiler_params=pltpu.CompilerParams(
            dimension_semantics=("parallel",),
            vmem_limit_bytes=_vmem_limit_bytes(tile_n, c, x.dtype, y.dtype, vmem_physical),
        ),
    )(x, y)

    loss = per_row[:, 0]
    if reduction == "mean":
        return jnp.mean(loss)
    elif reduction == "none":
        return loss
    else:
        raise NotImplementedError


if __name__ == "__main__":
    key = jax.random.PRNGKey(0)
    kx, ky, kx2, ky2 = jax.random.split(key, 4)

    # Small "classification head"-like shapes. C=400 (Kinetics-400) exercises
    # the non-128-multiple class axis (no wrapper pad anymore); N=6 exercises
    # the partial edge block.
    N, C = 6, 400
    x = jax.random.normal(kx, (N, C), dtype=jnp.float32)
    y = jax.nn.softmax(jax.random.normal(ky, (N, C), dtype=jnp.float32), axis=-1)

    out_none = jax.block_until_ready(soft_target_cross_entropy(x, y, "none"))
    out_mean = jax.block_until_ready(soft_target_cross_entropy(x, y, "mean"))

    ref_none = jnp.sum(-y * jax.nn.log_softmax(x, axis=-1), axis=-1)
    ref_mean = jnp.mean(ref_none)
    assert out_none.shape == (N,)
    assert jnp.allclose(out_none, ref_none, atol=1e-5, rtol=1e-5)
    assert jnp.allclose(out_mean, ref_mean, atol=1e-5, rtol=1e-5)

    # bf16 inputs: half the HBM bytes for this memory-bound kernel; tile_n is
    # automatically aligned to the 16-row bf16 sublane packing.
    N2, C2 = 32, 384
    x2 = jax.random.normal(kx2, (N2, C2), dtype=jnp.float32).astype(jnp.bfloat16)
    y2 = jax.nn.softmax(
        jax.random.normal(ky2, (N2, C2), dtype=jnp.float32), axis=-1
    ).astype(jnp.bfloat16)
    out2 = jax.block_until_ready(soft_target_cross_entropy(x2, y2, "none"))
    ref2 = jnp.sum(
        -y2.astype(jnp.float32) * jax.nn.log_softmax(x2.astype(jnp.float32), axis=-1),
        axis=-1,
    )
    assert jnp.allclose(out2, ref2, atol=1e-4, rtol=1e-4)

    print("KERNEL_OK")
</pallas_src>

<mosaic_0001>
module attributes {stable_mosaic.version = 11 : i64} {
  func.func @_stce_kernel(%arg0: i32, %arg1: memref<8x400xf32, #tpu.memory_space<vmem>>, %arg2: memref<8x400xf32, #tpu.memory_space<vmem>>, %arg3: memref<8x1xf32, #tpu.memory_space<vmem>>) attributes {dimension_semantics = [#tpu.dimension_semantics<parallel>], iteration_bounds = array<i64: 1>, scalar_prefetch = 0 : i64, scratch_operands = 0 : i64, tpu.core_type = #tpu.core_type<tc>, window_params = [{transform_indices = @transform_0, window_bounds = array<i64: 8, 400>}, {transform_indices = @transform_1, window_bounds = array<i64: 8, 400>}, {transform_indices = @transform_2, window_bounds = array<i64: 8, 1>}]} {
    %c0 = arith.constant 0 : index
    %c0_0 = arith.constant 0 : index
    %0 = vector.load %arg1[%c0, %c0_0] : memref<8x400xf32, #tpu.memory_space<vmem>>, vector<8x400xf32>
    %c0_1 = arith.constant 0 : index
    %c0_2 = arith.constant 0 : index
    %1 = vector.load %arg2[%c0_1, %c0_2] : memref<8x400xf32, #tpu.memory_space<vmem>>, vector<8x400xf32>
    %cst = arith.constant dense<0.000000e+00> : vector<8xf32>
    %2 = vector.multi_reduction <add>, %1, %cst [1] : vector<8x400xf32> to vector<8xf32>
    %3 = vector.shape_cast %2 : vector<8xf32> to vector<8x1xf32>
    %4 = arith.mulf %1, %0 : vector<8x400xf32>
    %cst_3 = arith.constant dense<0.000000e+00> : vector<8xf32>
    %5 = vector.multi_reduction <add>, %4, %cst_3 [1] : vector<8x400xf32> to vector<8xf32>
    %6 = vector.shape_cast %5 : vector<8xf32> to vector<8x1xf32>
    %cst_4 = arith.constant dense<0xFF800000> : vector<8xf32>
    %7 = vector.multi_reduction <maximumf>, %0, %cst_4 [1] : vector<8x400xf32> to vector<8xf32>
    %8 = vector.shape_cast %7 : vector<8xf32> to vector<8x1xf32>
    %9 = vector.broadcast %8 : vector<8x1xf32> to vector<8x400xf32>
    %10 = arith.subf %0, %9 : vector<8x400xf32>
    %11 = math.exp %10 : vector<8x400xf32>
    %cst_5 = arith.constant dense<0.000000e+00> : vector<8xf32>
    %12 = vector.multi_reduction <add>, %11, %cst_5 [1] : vector<8x400xf32> to vector<8xf32>
    %13 = vector.shape_cast %12 : vector<8xf32> to vector<8x1xf32>
    %14 = math.log %13 : vector<8x1xf32>
    %15 = arith.addf %8, %14 : vector<8x1xf32>
    %16 = arith.mulf %15, %3 : vector<8x1xf32>
    %17 = arith.subf %16, %6 : vector<8x1xf32>
    %c0_6 = arith.constant 0 : index
    %c0_7 = arith.constant 0 : index
    %18 = vector.load %arg3[%c0_6, %c0_7] : memref<8x1xf32, #tpu.memory_space<vmem>>, vector<8x1xf32>
    tpu.vector_store %arg3[%c0_6, %c0_7], %17 {strides = array<i32>} : memref<8x1xf32, #tpu.memory_space<vmem>>, vector<8x1xf32>,
    return
  }
  func.func @transform_0(%arg0: i32) -> (i32, i32) {
    %c0_i32 = arith.constant 0 : i32
    %c0_i32_0 = arith.constant 0 : i32
    return %arg0, %c0_i32 : i32, i32
  }
  func.func @transform_1(%arg0: i32) -> (i32, i32) {
    %c0_i32 = arith.constant 0 : i32
    %c0_i32_0 = arith.constant 0 : i32
    return %arg0, %c0_i32 : i32, i32
  }
  func.func @transform_2(%arg0: i32) -> (i32, i32) {
    %c0_i32 = arith.constant 0 : i32
    %c0_i32_0 = arith.constant 0 : i32
    return %arg0, %c0_i32 : i32, i32
  }
}

</mosaic_0001>

<bundles_post_ra>
// kernel: tpu_custom_call.1
= control target key start
LH: loop header
LB: loop body
LE: loop exit
PB: predicated region body
PF: predicated region fallthrough
CT: control target
= control target key end

     0   :  { %7 = vsyncpa [#allocation3], 0  ;;  %s205_s0 = inlined_call_operand.hbm [shape: f32[6,400], index: 0, kind: input, shape index: {}]   ;;  %s206_s1 = inlined_call_operand.hbm [shape: f32[6,400], index: 1, kind: input, shape index: {}]   ;;  %s207_s2 = inlined_call_operand.vmem [shape: f32[6,1], index: 2, kind: output, shape index: {}]  }
   0x1   :  { %8 = vsyncpa [#allocation5], 0  ;;  %s157_s9 = smov [#allocation2]   ;;  %s158_s11 = smov [#allocation4]  }
   0x2   :  { %s15_s10 = sshll.u32 %s157_s9, 4  ;;  %s25_s12 = sshll.u32 %s158_s11, 4  ;;  %s16_s10 = int_to_ptr.vmem [resolvable:$true] %s15_s10  ;;  %s26_s12 = int_to_ptr.vmem [resolvable:$true] %s25_s12 }
   0x3   :  { %s109_s15 = scalar_lea.hbm %s205_s0, 512 }
   0x4   :  { %p110_p0 = scmp.ne.s32.totalorder %s205_s0, %s109_s15  ;;  %p113_p1 = scmp.lt.u32.totalorder %s109_s15, %s205_s0 }
   0x6   :  { %p115_p2 = pnand %p113_p1, %p110_p0 }
   0x8   :  { %118 = shalt.err (!%p115_p2)
}
   0x9   :  { %s119_s20 = scalar_lea.vmem %s16_s10, 512  ;;  %p124_p4 = scmp.lt.s32.totalorder %s16_s10, %s16_s10 }
   0xa   :  { %p120_p3 = scmp.ne.s32.totalorder %s16_s10, %s119_s20  ;;  %p125_p5 = scmp.lt.s32.totalorder %s119_s20, %s119_s20 }
   0xc   :  { %p126_p6 = por %p125_p5, %p124_p4 }
   0xe   :  { %p127_p7 = pnand %p126_p6, %p120_p3 }
  0x10   :  { %130 = shalt.err (!%p127_p7)
}
  0x11   :  { %18 = dma.hbm_to_vmem [thread:$0]  %s205_s0, 512, %s16_s10, [#allocation3]  }
  0x12   :  { %s131_s25 = scalar_lea.hbm %s206_s1, 512 }
  0x13   :  { %p132_p8 = scmp.ne.s32.totalorder %s206_s1, %s131_s25  ;;  %p135_p9 = scmp.lt.u32.totalorder %s131_s25, %s206_s1 }
  0x15   :  { %p137_p10 = pnand %p135_p9, %p132_p8 }
  0x17   :  { %140 = shalt.err (!%p137_p10)
}
  0x18   :  { %s141_s30 = scalar_lea.vmem %s26_s12, 512  ;;  %p146_p12 = scmp.lt.s32.totalorder %s26_s12, %s26_s12 }
  0x19   :  { %p142_p11 = scmp.ne.s32.totalorder %s26_s12, %s141_s30  ;;  %p147_p13 = scmp.lt.s32.totalorder %s141_s30, %s141_s30 }
  0x1b   :  { %p148_p0 = por %p147_p13, %p146_p12 }
  0x1d   :  { %p149_p1 = pnand %p148_p0, %p142_p11 }
  0x1f   :  { %152 = shalt.err (!%p149_p1)
}
  0x20   :  { %28 = dma.hbm_to_vmem [thread:$0]  %s206_s1, 512, %s26_s12, [#allocation5]  }
  0x21   :  { %153 = dma.done.wait [#allocation3], 512  }
  0x22   :  { %154 = vsyncadd [#allocation3], 4294966784 }
  0x23   :  { %155 = dma.done.wait [#allocation5], 512  }
  0x24   :  { %156 = vsyncadd [#allocation5], 4294966784  ;;  %vm45_vm0 = vcmask 130048   ;;  %v35_v0 = vld [vmem:[#allocation2] sm:$0xff]  ;;  %v36_v1 = vld [vmem:[#allocation2 + $0x8] sm:$0xff]  ;;  %vm89_vm1 = vcmask 7168  }
  0x25   :  { %v37_v2 = vld [vmem:[#allocation2 + $0x10] sm:$0xff]  ;;  %v38_v3 = vld [vmem:[#allocation2 + $0x18] sm:$0xff]  ;;  %v61_v4 = vmax.f32 %v35_v0, %v36_v1  ;;  %v39_v8 = vld [vmem:[#allocation4] sm:$0xff] }
  0x26   :  { %v60_v5 = vsel %vm45_vm0, %v38_v3, -inf  ;;  %v40_v9 = vld [vmem:[#allocation4 + $0x8] sm:$0xff]  ;;  %v41_v10 = vld [vmem:[#allocation4 + $0x10] sm:$0xff]  ;;  %v42_v11 = vld [vmem:[#allocation4 + $0x18] sm:$0xff]  ;;  %v50_v13 = vmul.f32 %v39_v8, %v35_v0 }
  0x27   :  { %v62_v6 = vmax.f32 %v37_v2, %v60_v5  ;;  %v43_v12 = vadd.f32 %v40_v9, %v39_v8  ;;  %v51_v14 = vmul.f32 %v40_v9, %v36_v1  ;;  %v52_v15 = vmul.f32 %v41_v10, %v37_v2 }
  0x28   :  { %v46_v16 = vsel %vm45_vm0, %v42_v11, 0.0  ;;  %v53_v17 = vmul.f32 %v42_v11, %v38_v3 }
  0x29   :  { %v63_v7 = vmax.f32 %v61_v4, %v62_v6  ;;  %v44_v18 = vadd.f32 %v43_v12, %v41_v10  ;;  %v54_v19 = vadd.f32 %v51_v14, %v50_v13 }
  0x2a   :  { %v56_v20 = vsel %vm45_vm0, %v53_v17, 0.0 }
  0x2b   :  { %64 = vmax.xlane.f32.xlu0 %v63_v7  ;;  %v47_v21 = vadd.f32 %v46_v16, %v44_v18  ;;  %v55_v22 = vadd.f32 %v54_v19, %v52_v15 }
  0x2d   :  { %48 = vadd.xlane.f32.xlu1 %v47_v21  ;;  %v57_v23 = vadd.f32 %v56_v20, %v55_v22 }
  0x31   :  { %58 = vadd.xlane.f32.xlu1 %v57_v23 }
  0xb8   :  { %v65_v24 = vpop.xlane.xlu0 %64 }
  0xb9   :  { %v66_v25 = vsub.f32 %v35_v0, %v65_v24  ;;  %v67_v26 = vsub.f32 %v36_v1, %v65_v24  ;;  %v68_v27 = vsub.f32 %v37_v2, %v65_v24  ;;  %v69_v28 = vsub.f32 %v38_v3, %v65_v24 }
  0xba   :  { %v49_v42 = vpop.xlane.xlu1 %48 }
  0xbb   :  { %v70_v29 = vmul.f32 1.442695, %v66_v25  ;;  %v72_v30 = vmul.f32 1.442695, %v67_v26  ;;  %v74_v31 = vmul.f32 1.442695, %v68_v27 }
  0xbc   :  { %v76_v32 = vmul.f32 1.442695, %v69_v28 }
  0xbd   :  { %99 = vpow2.f32 %v70_v29 }
  0xbe   :  { %101 = vpow2.f32 %v72_v30  ;;  %v59_v46 = vpop.xlane.xlu1 %58 }
  0xbf   :  { %103 = vpow2.f32 %v74_v31 }
  0xc0   :  { %105 = vpow2.f32 %v76_v32 }
  0xc7   :  { %v100_v33 = vpop.eup %99 }
  0xc8   :  { %v102_v34 = vpop.eup %101 }
  0xc9   :  { %v104_v35 = vpop.eup %103  ;;  %v78_v36 = vadd.f32 %v102_v34, %v100_v33 }
  0xca   :  { %v106_v37 = vpop.eup %105 }
  0xcb   :  { %v79_v38 = vadd.f32 %v104_v35, %v78_v36  ;;  %v80_v39 = vsel %vm45_vm0, %v106_v37, 0.0 }
  0xcd   :  { %v81_v40 = vadd.f32 %v80_v39, %v79_v38 }
  0xcf   :  { %82 = vadd.xlane.f32.xlu0 %v81_v40 }
 0x15c   :  { %v83_v41 = vpop.xlane.xlu0 %82 }
 0x15d   :  { %107 = vlog2.f32 %v83_v41 }
 0x167   :  { %v108_v43 = vpop.eup %107 }
 0x168   :  { %v85_v44 = vmul.f32 0.6931472, %v108_v43 }
 0x16a   :  { %v86_v45 = vadd.f32 %v85_v44, %v65_v24 }
 0x16c   :  { %v87_v47 = vmul.f32 %v86_v45, %v49_v42 }
 0x16e   :  { %v88_v48 = vsub.f32 %v87_v47, %v59_v46 }
 0x170   :  { %90 = vst.msk [vmem:[%s207_s2] sm:$0xff] %vm89_vm1, %v88_v48 }
 0x171   :  { %95 = vsyncpa [#allocation3], 1 }
 0x172   :  { %96 = vsyncpa [#allocation5], 1 }

</bundles_post_ra>
